<compile_context>
chip_gen: v6e
topology: v6e:2x2x1
jax: 0.10.0
libtpu: 0.0.40
codegen_flags: <defaults>
</compile_context>

<pallas_src>
import functools
import math

import jax
import jax.numpy as jnp
from jax import lax
from jax.experimental import pallas as pl
from jax.experimental.pallas import tpu as pltpu

# Matmul operand dtype.  float32 preserves the PyTorch f32 numerics exactly;
# jnp.bfloat16 gives ~2-3x MXU throughput on v6e/v7x (accumulation stays f32).
_MM_DTYPE = jnp.float32


def _fit_tile(dim, preferred):
    """Largest preferred tile that evenly divides `dim`, else the full dim
    (a full-extent block is always a legal BlockSpec)."""
    for t in sorted(preferred, reverse=True):
        if dim >= t and dim % t == 0:
            return t
    return dim


# ---------------------------------------------------------------------------
# Tiled, batched linear:  (G, M, K) @ (G, K, N) + (G, 1, N) -> (G, M, N)
# ---------------------------------------------------------------------------
def linear_kernel(x_ref, w_ref, b_ref, o_ref, acc_ref):
    # Blocks: x (1, tm, tk), w (1, tk, tn), b (1, 1, tn), o (1, tm, tn).
    k = pl.program_id(3)

    @pl.when(k == 0)
    def _():
        acc_ref[...] = jnp.zeros_like(acc_ref)

    acc_ref[...] += jnp.dot(
        x_ref[0].astype(_MM_DTYPE),
        w_ref[0].astype(_MM_DTYPE),
        preferred_element_type=jnp.float32,
    )

    @pl.when(k == pl.num_programs(3) - 1)
    def _():
        o_ref[0] = (acc_ref[...] + b_ref[0]).astype(o_ref.dtype)


def linear_pallas(x, w, b):
    """Batched linear. x: (G, M, K), w: (G, K, N) (already (in, out), i.e.
    torch W^T), b: (G, 1, N)."""
    G, M, K = x.shape
    _, _, N = w.shape

    # Prefer 512 tiles (halves weight re-streaming vs 256 with huge VMEM
    # headroom: ~7 MiB resident at 512^3 f32); fall back to full dims for
    # small shapes.
    tm = _fit_tile(M, (512, 256, 128))
    tn = _fit_tile(N, (512, 256, 128))
    tk = _fit_tile(K, (512, 256, 128))

    grid = (G, M // tm, N // tn, K // tk)
    return pl.pallas_call(
        linear_kernel,
        out_shape=jax.ShapeDtypeStruct((G, M, N), x.dtype),
        grid=grid,
        in_specs=[
            pl.BlockSpec((1, tm, tk), lambda g, i, j, k: (g, i, k)),
            pl.BlockSpec((1, tk, tn), lambda g, i, j, k: (g, k, j)),
            pl.BlockSpec((1, 1, tn), lambda g, i, j, k: (g, 0, j)),
        ],
        out_specs=pl.BlockSpec((1, tm, tn), lambda g, i, j, k: (g, i, j)),
        scratch_shapes=[pltpu.VMEM((tm, tn), jnp.float32)],
        compiler_params=pltpu.CompilerParams(
            dimension_semantics=("parallel", "parallel", "parallel", "arbitrary"),
            vmem_limit_bytes=32 * 1024 * 1024,
        ),
    )(x, w, b)


# ---------------------------------------------------------------------------
# Flash-style attention: grid over (batch, head-block, Sq-tile, KV-tile) with
# online-softmax accumulators in VMEM scratch.  Activations stay (B, S, E);
# heads are contiguous lane groups inside each block.
# ---------------------------------------------------------------------------
def _attn_tile_prefs(e_blk, itemsize, budget_bytes=20 * 1024 * 1024):
    # Per-step resident bytes ~ tile * e_blk * (8*itemsize [q,k,v,o double-
    # buffered] + 4 [f32 acc]).  Keep under ~20 MiB (safe for v7x 64 MiB
    # physical / 32 MiB scoped, and for v5e's raised 32 MiB limit).
    prefs = tuple(t for t in (1024, 512, 256, 128)
                  if t * e_blk * (8 * itemsize + 4) <= budget_bytes)
    return prefs if prefs else (128,)


def flash_attn_kernel(q_ref, k_ref, v_ref, o_ref, m_ref, l_ref, acc_ref, *,
                      heads_per_block, head_dim, scale):
    ki = pl.program_id(3)

    @pl.when(ki == 0)
    def _():
        m_ref[...] = jnp.full_like(m_ref, -jnp.inf)
        l_ref[...] = jnp.zeros_like(l_ref)
        acc_ref[...] = jnp.zeros_like(acc_ref)

    q = q_ref[0]  # (tq,  e_blk)
    k = k_ref[0]  # (tkv, e_blk)
    v = v_ref[0]  # (tkv, e_blk)

    for h in range(heads_per_block):  # static unroll; heads are lane groups
        lo, hi = h * head_dim, (h + 1) * head_dim

        # NOTE: the PyTorch module divides by torch.rsqrt(d_k), i.e. it
        # MULTIPLIES scores by sqrt(d_k).  Reproduced exactly; the scale is
        # folded into q once (Sq*d VALU work instead of Sq*Sk).
        qh = (q[:, lo:hi] * scale).astype(_MM_DTYPE)
        kh = k[:, lo:hi].astype(_MM_DTYPE)
        vh = v[:, lo:hi]

        # q @ k^T via dot_general contracting the last dims (no k transpose).
        s = lax.dot_general(qh, kh, (((1,), (1,)), ((), ())),
                            preferred_element_type=jnp.float32)  # (tq, tkv)

        # TODO(synk): mask path (masked_fill(mask == 0, -9e15)) not wired; the
        # module is exercised with mask=None, dropout in eval mode (identity).
        m_prev = m_ref[:, h:h + 1]
        m_new = jnp.maximum(m_prev, jnp.max(s, axis=-1, keepdims=True))
        alpha = jnp.exp(m_prev - m_new)
        p = jnp.exp(s - m_new)
        l_ref[:, h:h + 1] = (alpha * l_ref[:, h:h + 1]
                             + jnp.sum(p, axis=-1, keepdims=True))
        acc_ref[:, lo:hi] = alpha * acc_ref[:, lo:hi] + jnp.dot(
            p.astype(_MM_DTYPE), vh.astype(_MM_DTYPE),
            preferred_element_type=jnp.float32)
        m_ref[:, h:h + 1] = m_new

    @pl.when(ki == pl.num_programs(3) - 1)
    def _():
        # Normalize each head's lane group in scratch (exact divide for strict
        # PyTorch parity), then ONE lane-dense store of the merged-head block.
        for h in range(heads_per_block):
            lo, hi = h * head_dim, (h + 1) * head_dim
            acc_ref[:, lo:hi] = acc_ref[:, lo:hi] / l_ref[:, h:h + 1]
        o_ref[0] = acc_ref[...].astype(o_ref.dtype)


def flash_attention_pallas(q, k, v, num_head):
    """q: (B, Sq, E), k/v: (B, Sk, E) -> (B, Sq, E) with heads merged."""
    B, Sq, E = q.shape
    _, Sk, _ = k.shape
    head_dim = E // num_head

    # Heads become a parallel grid axis when each head's slab is lane-aligned
    # (head_dim % 128 == 0): smaller per-step VMEM, no unrolled-body vreg
    # pressure, and an extra parallel axis for v7x's 2 TensorCores.  For
    # head_dim < 128 the (8,128) last-dim rule forbids per-head blocks, so all
    # heads are processed inside the kernel on full-E blocks.
    if head_dim % 128 == 0:
        num_h_blocks, heads_per_block = num_head, 1
    else:
        num_h_blocks, heads_per_block = 1, num_head
    e_blk = heads_per_block * head_dim

    prefs = _attn_tile_prefs(e_blk, jnp.dtype(q.dtype).itemsize)
    tq = _fit_tile(Sq, prefs)
    tkv = _fit_tile(Sk, prefs)

    kernel = functools.partial(
        flash_attn_kernel,
        heads_per_block=heads_per_block,
        head_dim=head_dim,
        scale=math.sqrt(float(head_dim)),  # reproduces the torch rsqrt usage
    )

    grid = (B, num_h_blocks, Sq // tq, Sk // tkv)
    return pl.pallas_call(
        kernel,
        out_shape=jax.ShapeDtypeStruct((B, Sq, E), q.dtype),
        grid=grid,
        in_specs=[
            pl.BlockSpec((1, tq, e_blk), lambda b, h, qi, ki: (b, qi, h)),
            # TODO(synk): sweep pipeline_mode=pl.Buffered(3) on K/V if a
            # profile shows exposed DMA at small KV tiles (mainly v5e).
            pl.BlockSpec((1, tkv, e_blk), lambda b, h, qi, ki: (b, ki, h)),
            pl.BlockSpec((1, tkv, e_blk), lambda b, h, qi, ki: (b, ki, h)),
        ],
        out_specs=pl.BlockSpec((1, tq, e_blk), lambda b, h, qi, ki: (b, qi, h)),
        scratch_shapes=[
            pltpu.VMEM((tq, heads_per_block), jnp.float32),  # running max  m
            pltpu.VMEM((tq, heads_per_block), jnp.float32),  # running sum  l
            pltpu.VMEM((tq, e_blk), jnp.float32),            # out accumulator
        ],
        compiler_params=pltpu.CompilerParams(
            dimension_semantics=("parallel", "parallel", "parallel", "arbitrary"),
            vmem_limit_bytes=32 * 1024 * 1024,
        ),
    )(q, k, v)


# ---------------------------------------------------------------------------
# MultiHeadAttention forward (glue in plain JAX, hot paths in Pallas)
# ---------------------------------------------------------------------------
def multi_head_attention(params, pre_query, pre_key=None, pre_value=None):
    self_attention = pre_key is None and pre_value is None
    if self_attention:
        pre_key = pre_value = pre_query

    B, Sq, E = pre_query.shape
    H = params["num_head"]

    if self_attention:
        # Fused QKV: x is read from HBM once; lane-dense (M, 3E) output slab.
        qkv = linear_pallas(
            pre_query.reshape(1, B * Sq, E),
            params["w_qkv_fused"][None],            # (1, E, 3E)
            params["b_qkv_fused"][None, None, :],   # (1, 1, 3E)
        )[0]
        q = qkv[:, :E].reshape(B, Sq, E)
        k = qkv[:, E:2 * E].reshape(B, Sq, E)
        v = qkv[:, 2 * E:].reshape(B, Sq, E)
    elif pre_query.shape == pre_key.shape == pre_value.shape:
        # General case with equal shapes: one batched call over a size-3 axis.
        xs = jnp.stack([pre_query.reshape(-1, E),
                        pre_key.reshape(-1, E),
                        pre_value.reshape(-1, E)])        # (3, B*S, E)
        qkv = linear_pallas(xs, params["w_qkv_t"], params["b_qkv"])
        q = qkv[0].reshape(pre_query.shape)
        k = qkv[1].reshape(pre_key.shape)
        v = qkv[2].reshape(pre_value.shape)
    else:
        # Cross-attention with differing shapes: one tiled call per input.
        def proj(i, x):
            y = linear_pallas(x.reshape(1, -1, E),
                              params["w_qkv_t"][i:i + 1],
                              params["b_qkv"][i:i + 1])
            return y.reshape(x.shape)
        q, k, v = proj(0, pre_query), proj(1, pre_key), proj(2, pre_value)

    # Attention: heads split/merged inside the kernel; no host-side
    # reshape/transpose round trips.
    attn = flash_attention_pallas(q, k, v, H)  # (B, Sq, E)

    # Output projection.
    # TODO(synk): optionally fuse this into the attention finalize when
    # w_out fits VMEM (saves one HBM write+read of the (B,Sq,E) activation).
    out = linear_pallas(
        attn.reshape(1, B * Sq, E),
        params["w_out_t"][None],
        params["b_out"][None, None, :],
    )
    return out.reshape(B, Sq, E)


# ---------------------------------------------------------------------------
# Pure-JAX reference mirroring the PyTorch module (eval mode, mask=None)
# ---------------------------------------------------------------------------
def reference_mha(params, pre_query, pre_key, pre_value):
    B, Sq, E = pre_query.shape
    H = params["num_head"]
    d = E // H
    hp = lax.Precision.HIGHEST

    def proj(i, x):
        y = jnp.dot(x.reshape(-1, E), params["w_qkv_t"][i], precision=hp)
        y = y + params["b_qkv"][i, 0]
        return y.reshape(x.shape[0], -1, H, d).transpose(0, 2, 1, 3)

    q, k, v = proj(0, pre_query), proj(1, pre_key), proj(2, pre_value)
    s = jnp.einsum("bhqd,bhkd->bhqk", q, k, precision=hp) * jnp.sqrt(jnp.float32(d))
    p = jax.nn.softmax(s, axis=-1)
    o = jnp.einsum("bhqk,bhkd->bhqd", p, v, precision=hp)
    o = o.transpose(0, 2, 1, 3).reshape(B * Sq, E)
    out = jnp.dot(o, params["w_out_t"], precision=hp) + params["b_out"]
    return out.reshape(B, Sq, E)


def init_params(key, hidden_size, num_head):
    assert hidden_size % num_head == 0
    bound = 1.0 / math.sqrt(hidden_size)
    ws, bs = [], []
    for i in range(4):
        kw, kb = jax.random.split(jax.random.fold_in(key, i))
        # torch.nn.Linear stores weight (out, in); we keep the transpose (in, out).
        w = jax.random.uniform(kw, (hidden_size, hidden_size), jnp.float32,
                               -bound, bound)
        b = jax.random.uniform(kb, (hidden_size,), jnp.float32, -bound, bound)
        ws.append(w)
        bs.append(b)
    return {
        "num_head": num_head,
        "w_qkv_t": jnp.stack(ws[:3]),                       # (3, E, E)
        "b_qkv": jnp.stack(bs[:3])[:, None, :],             # (3, 1, E)
        "w_qkv_fused": jnp.concatenate(ws[:3], axis=1),     # (E, 3E)
        "b_qkv_fused": jnp.concatenate(bs[:3]),             # (3E,)
        "w_out_t": ws[3],                                   # (E, E)
        "b_out": bs[3],                                     # (E,)
    }


if __name__ == "__main__":
    hidden_size, num_head = 32, 4
    B, S = 2, 8

    key = jax.random.PRNGKey(0)
    kq, kk, kv, kp = jax.random.split(key, 4)
    pre_query = jax.random.normal(kq, (B, S, hidden_size), jnp.float32)
    pre_key = jax.random.normal(kk, (B, S, hidden_size), jnp.float32)
    pre_value = jax.random.normal(kv, (B, S, hidden_size), jnp.float32)

    params = init_params(kp, hidden_size, num_head)

    # Cross-attention style call (three distinct inputs): batched QKV path.
    fwd = jax.jit(lambda q, k, v: multi_head_attention(params, q, k, v))
    out = jax.block_until_ready(fwd(pre_query, pre_key, pre_value))
    ref = reference_mha(params, pre_query, pre_key, pre_value)
    assert out.shape == (B, S, hidden_size)
    # Exact divide (no approx reciprocal) + f32 matmul operands -> tight parity.
    assert jnp.allclose(out, ref, atol=2e-3, rtol=2e-3)

    # Self-attention call (single input): fused x @ (E, 3E) QKV path.
    fwd_self = jax.jit(lambda x: multi_head_attention(params, x))
    out_self = jax.block_until_ready(fwd_self(pre_query))
    ref_self = reference_mha(params, pre_query, pre_query, pre_query)
    assert jnp.allclose(out_self, ref_self, atol=2e-3, rtol=2e-3)

    print("KERNEL_OK")
</pallas_src>

<mosaic_0001>
module attributes {stable_mosaic.version = 11 : i64} {
  func.func @flash_attn_kernel(%arg0: i32, %arg1: i32, %arg2: i32, %arg3: i32, %arg4: memref<1x8x32xf32, #tpu.memory_space<vmem>>, %arg5: memref<1x8x32xf32, #tpu.memory_space<vmem>>, %arg6: memref<1x8x32xf32, #tpu.memory_space<vmem>>, %arg7: memref<1x8x32xf32, #tpu.memory_space<vmem>>, %arg8: memref<8x4xf32, #tpu.memory_space<vmem>>, %arg9: memref<8x4xf32, #tpu.memory_space<vmem>>, %arg10: memref<8x32xf32, #tpu.memory_space<vmem>>) attributes {dimension_semantics = [#tpu.dimension_semantics<parallel>, #tpu.dimension_semantics<parallel>, #tpu.dimension_semantics<parallel>, #tpu.dimension_semantics<arbitrary>], iteration_bounds = array<i64: 2, 1, 1, 1>, scalar_prefetch = 0 : i64, scratch_operands = 3 : i64, tpu.core_type = #tpu.core_type<tc>, window_params = [{transform_indices = @transform_0, window_bounds = array<i64: 1, 8, 32>}, {transform_indices = @transform_1, window_bounds = array<i64: 1, 8, 32>}, {transform_indices = @transform_2, window_bounds = array<i64: 1, 8, 32>}, {transform_indices = @transform_3, window_bounds = array<i64: 1, 8, 32>}]} {
    %c0_i32 = arith.constant 0 : i32
    %0 = arith.cmpi eq, %arg3, %c0_i32 : i32
    %1 = arith.extui %0 : i1 to i32
    %c0_i32_0 = arith.constant 0 : i32
    %2 = arith.cmpi ne, %1, %c0_i32_0 : i32
    scf.if %2 {
      %cst_72 = arith.constant 0xFF800000 : f32
      %124 = vector.broadcast %cst_72 : f32 to vector<8x4xf32>
      %c0_73 = arith.constant 0 : index
      %c0_74 = arith.constant 0 : index
      %125 = vector.load %arg8[%c0_73, %c0_74] : memref<8x4xf32, #tpu.memory_space<vmem>>, vector<8x4xf32>
      tpu.vector_store %arg8[%c0_73, %c0_74], %124 {strides = array<i32>} : memref<8x4xf32, #tpu.memory_space<vmem>>, vector<8x4xf32>,
      %cst_75 = arith.constant 0.000000e+00 : f32
      %126 = vector.broadcast %cst_75 : f32 to vector<8x4xf32>
      %c0_76 = arith.constant 0 : index
      %c0_77 = arith.constant 0 : index
      %127 = vector.load %arg9[%c0_76, %c0_77] : memref<8x4xf32, #tpu.memory_space<vmem>>, vector<8x4xf32>
      tpu.vector_store %arg9[%c0_76, %c0_77], %126 {strides = array<i32>} : memref<8x4xf32, #tpu.memory_space<vmem>>, vector<8x4xf32>,
      %cst_78 = arith.constant 0.000000e+00 : f32
      %128 = vector.broadcast %cst_78 : f32 to vector<8x32xf32>
      %c0_79 = arith.constant 0 : index
      %c0_80 = arith.constant 0 : index
      %129 = vector.load %arg10[%c0_79, %c0_80] : memref<8x32xf32, #tpu.memory_space<vmem>>, vector<8x32xf32>
      tpu.vector_store %arg10[%c0_79, %c0_80], %128 {strides = array<i32>} : memref<8x32xf32, #tpu.memory_space<vmem>>, vector<8x32xf32>,
    } else {
    }
    %c0 = arith.constant 0 : index
    %c0_1 = arith.constant 0 : index
    %c0_2 = arith.constant 0 : index
    %3 = vector.load %arg4[%c0, %c0_1, %c0_2] : memref<1x8x32xf32, #tpu.memory_space<vmem>>, vector<1x8x32xf32>
    %4 = vector.shape_cast %3 : vector<1x8x32xf32> to vector<8x32xf32>
    %c0_3 = arith.constant 0 : index
    %c0_4 = arith.constant 0 : index
    %c0_5 = arith.constant 0 : index
    %5 = vector.load %arg5[%c0_3, %c0_4, %c0_5] : memref<1x8x32xf32, #tpu.memory_space<vmem>>, vector<1x8x32xf32>
    %6 = vector.shape_cast %5 : vector<1x8x32xf32> to vector<8x32xf32>
    %c0_6 = arith.constant 0 : index
    %c0_7 = arith.constant 0 : index
    %c0_8 = arith.constant 0 : index
    %7 = vector.load %arg6[%c0_6, %c0_7, %c0_8] : memref<1x8x32xf32, #tpu.memory_space<vmem>>, vector<1x8x32xf32>
    %8 = vector.shape_cast %7 : vector<1x8x32xf32> to vector<8x32xf32>
    %9 = vector.extract_strided_slice %4 {offsets = [0, 0], sizes = [8, 8], strides = [1, 1]} : vector<8x32xf32> to vector<8x8xf32>
    %cst = arith.constant 2.82842708 : f32
    %10 = vector.broadcast %cst : f32 to vector<8x8xf32>
    %11 = arith.mulf %9, %10 : vector<8x8xf32>
    %12 = vector.extract_strided_slice %6 {offsets = [0, 0], sizes = [8, 8], strides = [1, 1]} : vector<8x32xf32> to vector<8x8xf32>
    %13 = vector.extract_strided_slice %8 {offsets = [0, 0], sizes = [8, 8], strides = [1, 1]} : vector<8x32xf32> to vector<8x8xf32>
    %cst_9 = arith.constant dense<0.000000e+00> : vector<8x8xf32>
    %14 = tpu.matmul %11, %12, %cst_9 {dimension_numbers = #tpu.dot_dimension_numbers<[1], [1], [0], [0], [0, 0, 1, 0], [], []>} : vector<8x8xf32>, vector<8x8xf32>, vector<8x8xf32> -> vector<8x8xf32>
    %c0_10 = arith.constant 0 : index
    %c0_11 = arith.constant 0 : index
    %15 = vector.load %arg8[%c0_10, %c0_11] : memref<8x4xf32, #tpu.memory_space<vmem>>, vector<8x1xf32>
    %cst_12 = arith.constant dense<0xFF800000> : vector<8xf32>
    %16 = vector.multi_reduction <maximumf>, %14, %cst_12 [1] : vector<8x8xf32> to vector<8xf32>
    %17 = vector.shape_cast %16 : vector<8xf32> to vector<8x1xf32>
    %18 = arith.maximumf %15, %17 : vector<8x1xf32>
    %19 = arith.subf %15, %18 : vector<8x1xf32>
    %20 = math.exp %19 : vector<8x1xf32>
    %21 = vector.broadcast %18 : vector<8x1xf32> to vector<8x8xf32>
    %22 = arith.subf %14, %21 : vector<8x8xf32>
    %23 = math.exp %22 : vector<8x8xf32>
    %c0_13 = arith.constant 0 : index
    %c0_14 = arith.constant 0 : index
    %24 = vector.load %arg9[%c0_13, %c0_14] : memref<8x4xf32, #tpu.memory_space<vmem>>, vector<8x1xf32>
    %25 = arith.mulf %20, %24 : vector<8x1xf32>
    %cst_15 = arith.constant dense<0.000000e+00> : vector<8xf32>
    %26 = vector.multi_reduction <add>, %23, %cst_15 [1] : vector<8x8xf32> to vector<8xf32>
    %27 = vector.shape_cast %26 : vector<8xf32> to vector<8x1xf32>
    %28 = arith.addf %25, %27 : vector<8x1xf32>
    %c0_16 = arith.constant 0 : index
    %c0_17 = arith.constant 0 : index
    %29 = vector.load %arg9[%c0_16, %c0_17] : memref<8x4xf32, #tpu.memory_space<vmem>>, vector<8x1xf32>
    tpu.vector_store %arg9[%c0_16, %c0_17], %28 {strides = array<i32>} : memref<8x4xf32, #tpu.memory_space<vmem>>, vector<8x1xf32>,
    %c0_18 = arith.constant 0 : index
    %c0_19 = arith.constant 0 : index
    %30 = vector.load %arg10[%c0_18, %c0_19] : memref<8x32xf32, #tpu.memory_space<vmem>>, vector<8x8xf32>
    %31 = vector.broadcast %20 : vector<8x1xf32> to vector<8x8xf32>
    %32 = arith.mulf %31, %30 : vector<8x8xf32>
    %cst_20 = arith.constant dense<0.000000e+00> : vector<8x8xf32>
    %33 = tpu.matmul %23, %13, %cst_20 {dimension_numbers = #tpu.dot_dimension_numbers<[1], [0], [0], [1], [0, 0, 1, 1], [], []>} : vector<8x8xf32>, vector<8x8xf32>, vector<8x8xf32> -> vector<8x8xf32>
    %34 = arith.addf %32, %33 : vector<8x8xf32>
    %c0_21 = arith.constant 0 : index
    %c0_22 = arith.constant 0 : index
    %35 = vector.load %arg10[%c0_21, %c0_22] : memref<8x32xf32, #tpu.memory_space<vmem>>, vector<8x8xf32>
    tpu.vector_store %arg10[%c0_21, %c0_22], %34 {strides = array<i32>} : memref<8x32xf32, #tpu.memory_space<vmem>>, vector<8x8xf32>,
    %c0_23 = arith.constant 0 : index
    %c0_24 = arith.constant 0 : index
    %36 = vector.load %arg8[%c0_23, %c0_24] : memref<8x4xf32, #tpu.memory_space<vmem>>, vector<8x1xf32>
    tpu.vector_store %arg8[%c0_23, %c0_24], %18 {strides = array<i32>} : memref<8x4xf32, #tpu.memory_space<vmem>>, vector<8x1xf32>,
    %37 = vector.extract_strided_slice %4 {offsets = [0, 8], sizes = [8, 8], strides = [1, 1]} : vector<8x32xf32> to vector<8x8xf32>
    %cst_25 = arith.constant 2.82842708 : f32
    %38 = vector.broadcast %cst_25 : f32 to vector<8x8xf32>
    %39 = arith.mulf %37, %38 : vector<8x8xf32>
    %40 = vector.extract_strided_slice %6 {offsets = [0, 8], sizes = [8, 8], strides = [1, 1]} : vector<8x32xf32> to vector<8x8xf32>
    %41 = vector.extract_strided_slice %8 {offsets = [0, 8], sizes = [8, 8], strides = [1, 1]} : vector<8x32xf32> to vector<8x8xf32>
    %cst_26 = arith.constant dense<0.000000e+00> : vector<8x8xf32>
    %42 = tpu.matmul %39, %40, %cst_26 {dimension_numbers = #tpu.dot_dimension_numbers<[1], [1], [0], [0], [0, 0, 1, 0], [], []>} : vector<8x8xf32>, vector<8x8xf32>, vector<8x8xf32> -> vector<8x8xf32>
    %c0_27 = arith.constant 0 : index
    %c1 = arith.constant 1 : index
    %43 = vector.load %arg8[%c0_27, %c1] : memref<8x4xf32, #tpu.memory_space<vmem>>, vector<8x1xf32>
    %cst_28 = arith.constant dense<0xFF800000> : vector<8xf32>
    %44 = vector.multi_reduction <maximumf>, %42, %cst_28 [1] : vector<8x8xf32> to vector<8xf32>
    %45 = vector.shape_cast %44 : vector<8xf32> to vector<8x1xf32>
    %46 = arith.maximumf %43, %45 : vector<8x1xf32>
    %47 = arith.subf %43, %46 : vector<8x1xf32>
    %48 = math.exp %47 : vector<8x1xf32>
    %49 = vector.broadcast %46 : vector<8x1xf32> to vector<8x8xf32>
    %50 = arith.subf %42, %49 : vector<8x8xf32>
    %51 = math.exp %50 : vector<8x8xf32>
    %c0_29 = arith.constant 0 : index
    %c1_30 = arith.constant 1 : index
    %52 = vector.load %arg9[%c0_29, %c1_30] : memref<8x4xf32, #tpu.memory_space<vmem>>, vector<8x1xf32>
    %53 = arith.mulf %48, %52 : vector<8x1xf32>
    %cst_31 = arith.constant dense<0.000000e+00> : vector<8xf32>
    %54 = vector.multi_reduction <add>, %51, %cst_31 [1] : vector<8x8xf32> to vector<8xf32>
    %55 = vector.shape_cast %54 : vector<8xf32> to vector<8x1xf32>
    %56 = arith.addf %53, %55 : vector<8x1xf32>
    %c0_32 = arith.constant 0 : index
    %c1_33 = arith.constant 1 : index
    %57 = vector.load %arg9[%c0_32, %c1_33] : memref<8x4xf32, #tpu.memory_space<vmem>>, vector<8x1xf32>
    tpu.vector_store %arg9[%c0_32, %c1_33], %56 {strides = array<i32>} : memref<8x4xf32, #tpu.memory_space<vmem>>, vector<8x1xf32>,
    %c0_34 = arith.constant 0 : index
    %c8 = arith.constant 8 : index
    %58 = vector.load %arg10[%c0_34, %c8] : memref<8x32xf32, #tpu.memory_space<vmem>>, vector<8x8xf32>
    %59 = vector.broadcast %48 : vector<8x1xf32> to vector<8x8xf32>
    %60 = arith.mulf %59, %58 : vector<8x8xf32>
    %cst_35 = arith.constant dense<0.000000e+00> : vector<8x8xf32>
    %61 = tpu.matmul %51, %41, %cst_35 {dimension_numbers = #tpu.dot_dimension_numbers<[1], [0], [0], [1], [0, 0, 1, 1], [], []>} : vector<8x8xf32>, vector<8x8xf32>, vector<8x8xf32> -> vector<8x8xf32>
    %62 = arith.addf %60, %61 : vector<8x8xf32>
    %c0_36 = arith.constant 0 : index
    %c8_37 = arith.constant 8 : index
    %63 = vector.load %arg10[%c0_36, %c8_37] : memref<8x32xf32, #tpu.memory_space<vmem>>, vector<8x8xf32>
    tpu.vector_store %arg10[%c0_36, %c8_37], %62 {strides = array<i32>} : memref<8x32xf32, #tpu.memory_space<vmem>>, vector<8x8xf32>,
    %c0_38 = arith.constant 0 : index
    %c1_39 = arith.constant 1 : index
    %64 = vector.load %arg8[%c0_38, %c1_39] : memref<8x4xf32, #tpu.memory_space<vmem>>, vector<8x1xf32>
    tpu.vector_store %arg8[%c0_38, %c1_39], %46 {strides = array<i32>} : memref<8x4xf32, #tpu.memory_space<vmem>>, vector<8x1xf32>,
    %65 = vector.extract_strided_slice %4 {offsets = [0, 16], sizes = [8, 8], strides = [1, 1]} : vector<8x32xf32> to vector<8x8xf32>
    %cst_40 = arith.constant 2.82842708 : f32
    %66 = vector.broadcast %cst_40 : f32 to vector<8x8xf32>
    %67 = arith.mulf %65, %66 : vector<8x8xf32>
    %68 = vector.extract_strided_slice %6 {offsets = [0, 16], sizes = [8, 8], strides = [1, 1]} : vector<8x32xf32> to vector<8x8xf32>
    %69 = vector.extract_strided_slice %8 {offsets = [0, 16], sizes = [8, 8], strides = [1, 1]} : vector<8x32xf32> to vector<8x8xf32>
    %cst_41 = arith.constant dense<0.000000e+00> : vector<8x8xf32>
    %70 = tpu.matmul %67, %68, %cst_41 {dimension_numbers = #tpu.dot_dimension_numbers<[1], [1], [0], [0], [0, 0, 1, 0], [], []>} : vector<8x8xf32>, vector<8x8xf32>, vector<8x8xf32> -> vector<8x8xf32>
    %c0_42 = arith.constant 0 : index
    %c2 = arith.constant 2 : index
    %71 = vector.load %arg8[%c0_42, %c2] : memref<8x4xf32, #tpu.memory_space<vmem>>, vector<8x1xf32>
    %cst_43 = arith.constant dense<0xFF800000> : vector<8xf32>
    %72 = vector.multi_reduction <maximumf>, %70, %cst_43 [1] : vector<8x8xf32> to vector<8xf32>
    %73 = vector.shape_cast %72 : vector<8xf32> to vector<8x1xf32>
    %74 = arith.maximumf %71, %73 : vector<8x1xf32>
    %75 = arith.subf %71, %74 : vector<8x1xf32>
    %76 = math.exp %75 : vector<8x1xf32>
    %77 = vector.broadcast %74 : vector<8x1xf32> to vector<8x8xf32>
    %78 = arith.subf %70, %77 : vector<8x8xf32>
    %79 = math.exp %78 : vector<8x8xf32>
    %c0_44 = arith.constant 0 : index
    %c2_45 = arith.constant 2 : index
    %80 = vector.load %arg9[%c0_44, %c2_45] : memref<8x4xf32, #tpu.memory_space<vmem>>, vector<8x1xf32>
    %81 = arith.mulf %76, %80 : vector<8x1xf32>
    %cst_46 = arith.constant dense<0.000000e+00> : vector<8xf32>
    %82 = vector.multi_reduction <add>, %79, %cst_46 [1] : vector<8x8xf32> to vector<8xf32>
    %83 = vector.shape_cast %82 : vector<8xf32> to vector<8x1xf32>
    %84 = arith.addf %81, %83 : vector<8x1xf32>
    %c0_47 = arith.constant 0 : index
    %c2_48 = arith.constant 2 : index
    %85 = vector.load %arg9[%c0_47, %c2_48] : memref<8x4xf32, #tpu.memory_space<vmem>>, vector<8x1xf32>
    tpu.vector_store %arg9[%c0_47, %c2_48], %84 {strides = array<i32>} : memref<8x4xf32, #tpu.memory_space<vmem>>, vector<8x1xf32>,
    %c0_49 = arith.constant 0 : index
    %c16 = arith.constant 16 : index
    %86 = vector.load %arg10[%c0_49, %c16] : memref<8x32xf32, #tpu.memory_space<vmem>>, vector<8x8xf32>
    %87 = vector.broadcast %76 : vector<8x1xf32> to vector<8x8xf32>
    %88 = arith.mulf %87, %86 : vector<8x8xf32>
    %cst_50 = arith.constant dense<0.000000e+00> : vector<8x8xf32>
    %89 = tpu.matmul %79, %69, %cst_50 {dimension_numbers = #tpu.dot_dimension_numbers<[1], [0], [0], [1], [0, 0, 1, 1], [], []>} : vector<8x8xf32>, vector<8x8xf32>, vector<8x8xf32> -> vector<8x8xf32>
    %90 = arith.addf %88, %89 : vector<8x8xf32>
    %c0_51 = arith.constant 0 : index
    %c16_52 = arith.constant 16 : index
    %91 = vector.load %arg10[%c0_51, %c16_52] : memref<8x32xf32, #tpu.memory_space<vmem>>, vector<8x8xf32>
    tpu.vector_store %arg10[%c0_51, %c16_52], %90 {strides = array<i32>} : memref<8x32xf32, #tpu.memory_space<vmem>>, vector<8x8xf32>,
    %c0_53 = arith.constant 0 : index
    %c2_54 = arith.constant 2 : index
    %92 = vector.load %arg8[%c0_53, %c2_54] : memref<8x4xf32, #tpu.memory_space<vmem>>, vector<8x1xf32>
    tpu.vector_store %arg8[%c0_53, %c2_54], %74 {strides = array<i32>} : memref<8x4xf32, #tpu.memory_space<vmem>>, vector<8x1xf32>,
    %93 = vector.extract_strided_slice %4 {offsets = [0, 24], sizes = [8, 8], strides = [1, 1]} : vector<8x32xf32> to vector<8x8xf32>
    %cst_55 = arith.constant 2.82842708 : f32
    %94 = vector.broadcast %cst_55 : f32 to vector<8x8xf32>
    %95 = arith.mulf %93, %94 : vector<8x8xf32>
    %96 = vector.extract_strided_slice %6 {offsets = [0, 24], sizes = [8, 8], strides = [1, 1]} : vector<8x32xf32> to vector<8x8xf32>
    %97 = vector.extract_strided_slice %8 {offsets = [0, 24], sizes = [8, 8], strides = [1, 1]} : vector<8x32xf32> to vector<8x8xf32>
    %cst_56 = arith.constant dense<0.000000e+00> : vector<8x8xf32>
    %98 = tpu.matmul %95, %96, %cst_56 {dimension_numbers = #tpu.dot_dimension_numbers<[1], [1], [0], [0], [0, 0, 1, 0], [], []>} : vector<8x8xf32>, vector<8x8xf32>, vector<8x8xf32> -> vector<8x8xf32>
    %c0_57 = arith.constant 0 : index
    %c3 = arith.constant 3 : index
    %99 = vector.load %arg8[%c0_57, %c3] : memref<8x4xf32, #tpu.memory_space<vmem>>, vector<8x1xf32>
    %cst_58 = arith.constant dense<0xFF800000> : vector<8xf32>
    %100 = vector.multi_reduction <maximumf>, %98, %cst_58 [1] : vector<8x8xf32> to vector<8xf32>
    %101 = vector.shape_cast %100 : vector<8xf32> to vector<8x1xf32>
    %102 = arith.maximumf %99, %101 : vector<8x1xf32>
    %103 = arith.subf %99, %102 : vector<8x1xf32>
    %104 = math.exp %103 : vector<8x1xf32>
    %105 = vector.broadcast %102 : vector<8x1xf32> to vector<8x8xf32>
    %106 = arith.subf %98, %105 : vector<8x8xf32>
    %107 = math.exp %106 : vector<8x8xf32>
    %c0_59 = arith.constant 0 : index
    %c3_60 = arith.constant 3 : index
    %108 = vector.load %arg9[%c0_59, %c3_60] : memref<8x4xf32, #tpu.memory_space<vmem>>, vector<8x1xf32>
    %109 = arith.mulf %104, %108 : vector<8x1xf32>
    %cst_61 = arith.constant dense<0.000000e+00> : vector<8xf32>
    %110 = vector.multi_reduction <add>, %107, %cst_61 [1] : vector<8x8xf32> to vector<8xf32>
    %111 = vector.shape_cast %110 : vector<8xf32> to vector<8x1xf32>
    %112 = arith.addf %109, %111 : vector<8x1xf32>
    %c0_62 = arith.constant 0 : index
    %c3_63 = arith.constant 3 : index
    %113 = vector.load %arg9[%c0_62, %c3_63] : memref<8x4xf32, #tpu.memory_space<vmem>>, vector<8x1xf32>
    tpu.vector_store %arg9[%c0_62, %c3_63], %112 {strides = array<i32>} : memref<8x4xf32, #tpu.memory_space<vmem>>, vector<8x1xf32>,
    %c0_64 = arith.constant 0 : index
    %c24 = arith.constant 24 : index
    %114 = vector.load %arg10[%c0_64, %c24] : memref<8x32xf32, #tpu.memory_space<vmem>>, vector<8x8xf32>
    %115 = vector.broadcast %104 : vector<8x1xf32> to vector<8x8xf32>
    %116 = arith.mulf %115, %114 : vector<8x8xf32>
    %cst_65 = arith.constant dense<0.000000e+00> : vector<8x8xf32>
    %117 = tpu.matmul %107, %97, %cst_65 {dimension_numbers = #tpu.dot_dimension_numbers<[1], [0], [0], [1], [0, 0, 1, 1], [], []>} : vector<8x8xf32>, vector<8x8xf32>, vector<8x8xf32> -> vector<8x8xf32>
    %118 = arith.addf %116, %117 : vector<8x8xf32>
    %c0_66 = arith.constant 0 : index
    %c24_67 = arith.constant 24 : index
    %119 = vector.load %arg10[%c0_66, %c24_67] : memref<8x32xf32, #tpu.memory_space<vmem>>, vector<8x8xf32>
    tpu.vector_store %arg10[%c0_66, %c24_67], %118 {strides = array<i32>} : memref<8x32xf32, #tpu.memory_space<vmem>>, vector<8x8xf32>,
    %c0_68 = arith.constant 0 : index
    %c3_69 = arith.constant 3 : index
    %120 = vector.load %arg8[%c0_68, %c3_69] : memref<8x4xf32, #tpu.memory_space<vmem>>, vector<8x1xf32>
    tpu.vector_store %arg8[%c0_68, %c3_69], %102 {strides = array<i32>} : memref<8x4xf32, #tpu.memory_space<vmem>>, vector<8x1xf32>,
    %c0_i32_70 = arith.constant 0 : i32
    %121 = arith.cmpi eq, %arg3, %c0_i32_70 : i32
    %122 = arith.extui %121 : i1 to i32
    %c0_i32_71 = arith.constant 0 : i32
    %123 = arith.cmpi ne, %122, %c0_i32_71 : i32
    scf.if %123 {
      %c0_72 = arith.constant 0 : index
      %c0_73 = arith.constant 0 : index
      %124 = vector.load %arg10[%c0_72, %c0_73] : memref<8x32xf32, #tpu.memory_space<vmem>>, vector<8x8xf32>
      %c0_74 = arith.constant 0 : index
      %c0_75 = arith.constant 0 : index
      %125 = vector.load %arg9[%c0_74, %c0_75] : memref<8x4xf32, #tpu.memory_space<vmem>>, vector<8x1xf32>
      %126 = vector.broadcast %125 : vector<8x1xf32> to vector<8x8xf32>
      %127 = arith.divf %124, %126 : vector<8x8xf32>
      %c0_76 = arith.constant 0 : index
      %c0_77 = arith.constant 0 : index
      %128 = vector.load %arg10[%c0_76, %c0_77] : memref<8x32xf32, #tpu.memory_space<vmem>>, vector<8x8xf32>
      tpu.vector_store %arg10[%c0_76, %c0_77], %127 {strides = array<i32>} : memref<8x32xf32, #tpu.memory_space<vmem>>, vector<8x8xf32>,
      %c0_78 = arith.constant 0 : index
      %c8_79 = arith.constant 8 : index
      %129 = vector.load %arg10[%c0_78, %c8_79] : memref<8x32xf32, #tpu.memory_space<vmem>>, vector<8x8xf32>
      %c0_80 = arith.constant 0 : index
      %c1_81 = arith.constant 1 : index
      %130 = vector.load %arg9[%c0_80, %c1_81] : memref<8x4xf32, #tpu.memory_space<vmem>>, vector<8x1xf32>
      %131 = vector.broadcast %130 : vector<8x1xf32> to vector<8x8xf32>
      %132 = arith.divf %129, %131 : vector<8x8xf32>
      %c0_82 = arith.constant 0 : index
      %c8_83 = arith.constant 8 : index
      %133 = vector.load %arg10[%c0_82, %c8_83] : memref<8x32xf32, #tpu.memory_space<vmem>>, vector<8x8xf32>
      tpu.vector_store %arg10[%c0_82, %c8_83], %132 {strides = array<i32>} : memref<8x32xf32, #tpu.memory_space<vmem>>, vector<8x8xf32>,
      %c0_84 = arith.constant 0 : index
      %c16_85 = arith.constant 16 : index
      %134 = vector.load %arg10[%c0_84, %c16_85] : memref<8x32xf32, #tpu.memory_space<vmem>>, vector<8x8xf32>
      %c0_86 = arith.constant 0 : index
      %c2_87 = arith.constant 2 : index
      %135 = vector.load %arg9[%c0_86, %c2_87] : memref<8x4xf32, #tpu.memory_space<vmem>>, vector<8x1xf32>
      %136 = vector.broadcast %135 : vector<8x1xf32> to vector<8x8xf32>
      %137 = arith.divf %134, %136 : vector<8x8xf32>
      %c0_88 = arith.constant 0 : index
      %c16_89 = arith.constant 16 : index
      %138 = vector.load %arg10[%c0_88, %c16_89] : memref<8x32xf32, #tpu.memory_space<vmem>>, vector<8x8xf32>
      tpu.vector_store %arg10[%c0_88, %c16_89], %137 {strides = array<i32>} : memref<8x32xf32, #tpu.memory_space<vmem>>, vector<8x8xf32>,
      %c0_90 = arith.constant 0 : index
      %c24_91 = arith.constant 24 : index
      %139 = vector.load %arg10[%c0_90, %c24_91] : memref<8x32xf32, #tpu.memory_space<vmem>>, vector<8x8xf32>
      %c0_92 = arith.constant 0 : index
      %c3_93 = arith.constant 3 : index
      %140 = vector.load %arg9[%c0_92, %c3_93] : memref<8x4xf32, #tpu.memory_space<vmem>>, vector<8x1xf32>
      %141 = vector.broadcast %140 : vector<8x1xf32> to vector<8x8xf32>
      %142 = arith.divf %139, %141 : vector<8x8xf32>
      %c0_94 = arith.constant 0 : index
      %c24_95 = arith.constant 24 : index
      %143 = vector.load %arg10[%c0_94, %c24_95] : memref<8x32xf32, #tpu.memory_space<vmem>>, vector<8x8xf32>
      tpu.vector_store %arg10[%c0_94, %c24_95], %142 {strides = array<i32>} : memref<8x32xf32, #tpu.memory_space<vmem>>, vector<8x8xf32>,
      %c0_96 = arith.constant 0 : index
      %c0_97 = arith.constant 0 : index
      %144 = vector.load %arg10[%c0_96, %c0_97] : memref<8x32xf32, #tpu.memory_space<vmem>>, vector<8x32xf32>
      %c0_98 = arith.constant 0 : index
      %c0_99 = arith.constant 0 : index
      %c0_100 = arith.constant 0 : index
      %145 = vector.load %arg7[%c0_98, %c0_99, %c0_100] : memref<1x8x32xf32, #tpu.memory_space<vmem>>, vector<1x8x32xf32>
      %146 = vector.shape_cast %145 : vector<1x8x32xf32> to vector<8x32xf32>
      %147 = vector.shape_cast %144 : vector<8x32xf32> to vector<1x8x32xf32>
      tpu.vector_store %arg7[%c0_98, %c0_99, %c0_100], %147 {strides = array<i32>} : memref<1x8x32xf32, #tpu.memory_space<vmem>>, vector<1x8x32xf32>,
    } else {
    }
    return
  }
  func.func @transform_0(%arg0: i32, %arg1: i32, %arg2: i32, %arg3: i32) -> (i32, i32, i32) {
    %c0_i32 = arith.constant 0 : i32
    return %arg0, %arg2, %arg1 : i32, i32, i32
  }
  func.func @transform_1(%arg0: i32, %arg1: i32, %arg2: i32, %arg3: i32) -> (i32, i32, i32) {
    %c0_i32 = arith.constant 0 : i32
    return %arg0, %arg3, %arg1 : i32, i32, i32
  }
  func.func @transform_2(%arg0: i32, %arg1: i32, %arg2: i32, %arg3: i32) -> (i32, i32, i32) {
    %c0_i32 = arith.constant 0 : i32
    return %arg0, %arg3, %arg1 : i32, i32, i32
  }
  func.func @transform_3(%arg0: i32, %arg1: i32, %arg2: i32, %arg3: i32) -> (i32, i32, i32) {
    %c0_i32 = arith.constant 0 : i32
    return %arg0, %arg2, %arg1 : i32, i32, i32
  }
}

module attributes {stable_mosaic.version = 11 : i64} {
  func.func @linear_kernel(%arg0: i32, %arg1: i32, %arg2: i32, %arg3: i32, %arg4: memref<1x16x32xf32, #tpu.memory_space<vmem>>, %arg5: memref<1x32x32xf32, #tpu.memory_space<vmem>>, %arg6: memref<1x1x32xf32, #tpu.memory_space<vmem>>, %arg7: memref<1x16x32xf32, #tpu.memory_space<vmem>>, %arg8: memref<16x32xf32, #tpu.memory_space<vmem>>) attributes {dimension_semantics = [#tpu.dimension_semantics<parallel>, #tpu.dimension_semantics<parallel>, #tpu.dimension_semantics<parallel>, #tpu.dimension_semantics<arbitrary>], iteration_bounds = array<i64: 3, 1, 1, 1>, scalar_prefetch = 0 : i64, scratch_operands = 1 : i64, tpu.core_type = #tpu.core_type<tc>, window_params = [{transform_indices = @transform_0, window_bounds = array<i64: 1, 16, 32>}, {transform_indices = @transform_1, window_bounds = array<i64: 1, 32, 32>}, {transform_indices = @transform_2, window_bounds = array<i64: 1, 1, 32>}, {transform_indices = @transform_3, window_bounds = array<i64: 1, 16, 32>}]} {
    %c0_i32 = arith.constant 0 : i32
    %0 = arith.cmpi eq, %arg3, %c0_i32 : i32
    %1 = arith.extui %0 : i1 to i32
    %c0_i32_0 = arith.constant 0 : i32
    %2 = arith.cmpi ne, %1, %c0_i32_0 : i32
    scf.if %2 {
      %cst_12 = arith.constant 0.000000e+00 : f32
      %14 = vector.broadcast %cst_12 : f32 to vector<16x32xf32>
      %c0_13 = arith.constant 0 : index
      %c0_14 = arith.constant 0 : index
      %15 = vector.load %arg8[%c0_13, %c0_14] : memref<16x32xf32, #tpu.memory_space<vmem>>, vector<16x32xf32>
      tpu.vector_store %arg8[%c0_13, %c0_14], %14 {strides = array<i32>} : memref<16x32xf32, #tpu.memory_space<vmem>>, vector<16x32xf32>,
    } else {
    }
    %c0 = arith.constant 0 : index
    %c0_1 = arith.constant 0 : index
    %3 = vector.load %arg8[%c0, %c0_1] : memref<16x32xf32, #tpu.memory_space<vmem>>, vector<16x32xf32>
    %c0_2 = arith.constant 0 : index
    %c0_3 = arith.constant 0 : index
    %c0_4 = arith.constant 0 : index
    %4 = vector.load %arg4[%c0_2, %c0_3, %c0_4] : memref<1x16x32xf32, #tpu.memory_space<vmem>>, vector<1x16x32xf32>
    %5 = vector.shape_cast %4 : vector<1x16x32xf32> to vector<16x32xf32>
    %c0_5 = arith.constant 0 : index
    %c0_6 = arith.constant 0 : index
    %c0_7 = arith.constant 0 : index
    %6 = vector.load %arg5[%c0_5, %c0_6, %c0_7] : memref<1x32x32xf32, #tpu.memory_space<vmem>>, vector<1x32x32xf32>
    %7 = vector.shape_cast %6 : vector<1x32x32xf32> to vector<32x32xf32>
    %cst = arith.constant dense<0.000000e+00> : vector<16x32xf32>
    %8 = tpu.matmul %5, %7, %cst {dimension_numbers = #tpu.dot_dimension_numbers<[1], [0], [0], [1], [0, 0, 1, 1], [], []>} : vector<16x32xf32>, vector<32x32xf32>, vector<16x32xf32> -> vector<16x32xf32>
    %9 = arith.addf %3, %8 : vector<16x32xf32>
    %c0_8 = arith.constant 0 : index
    %c0_9 = arith.constant 0 : index
    %10 = vector.load %arg8[%c0_8, %c0_9] : memref<16x32xf32, #tpu.memory_space<vmem>>, vector<16x32xf32>
    tpu.vector_store %arg8[%c0_8, %c0_9], %9 {strides = array<i32>} : memref<16x32xf32, #tpu.memory_space<vmem>>, vector<16x32xf32>,
    %c0_i32_10 = arith.constant 0 : i32
    %11 = arith.cmpi eq, %arg3, %c0_i32_10 : i32
    %12 = arith.extui %11 : i1 to i32
    %c0_i32_11 = arith.constant 0 : i32
    %13 = arith.cmpi ne, %12, %c0_i32_11 : i32
    scf.if %13 {
      %c0_12 = arith.constant 0 : index
      %c0_13 = arith.constant 0 : index
      %14 = vector.load %arg8[%c0_12, %c0_13] : memref<16x32xf32, #tpu.memory_space<vmem>>, vector<16x32xf32>
      %c0_14 = arith.constant 0 : index
      %c0_15 = arith.constant 0 : index
      %c0_16 = arith.constant 0 : index
      %15 = vector.load %arg6[%c0_14, %c0_15, %c0_16] : memref<1x1x32xf32, #tpu.memory_space<vmem>>, vector<1x1x32xf32>
      %16 = vector.shape_cast %15 : vector<1x1x32xf32> to vector<1x32xf32>
      %17 = vector.broadcast %16 : vector<1x32xf32> to vector<16x32xf32>
      %18 = arith.addf %14, %17 : vector<16x32xf32>
      %c0_17 = arith.constant 0 : index
      %c0_18 = arith.constant 0 : index
      %c0_19 = arith.constant 0 : index
      %19 = vector.load %arg7[%c0_17, %c0_18, %c0_19] : memref<1x16x32xf32, #tpu.memory_space<vmem>>, vector<1x16x32xf32>
      %20 = vector.shape_cast %19 : vector<1x16x32xf32> to vector<16x32xf32>
      %21 = vector.shape_cast %18 : vector<16x32xf32> to vector<1x16x32xf32>
      tpu.vector_store %arg7[%c0_17, %c0_18, %c0_19], %21 {strides = array<i32>} : memref<1x16x32xf32, #tpu.memory_space<vmem>>, vector<1x16x32xf32>,
    } else {
    }
    return
  }
  func.func @transform_0(%arg0: i32, %arg1: i32, %arg2: i32, %arg3: i32) -> (i32, i32, i32) {
    %c0_i32 = arith.constant 0 : i32
    return %arg0, %arg1, %arg3 : i32, i32, i32
  }
  func.func @transform_1(%arg0: i32, %arg1: i32, %arg2: i32, %arg3: i32) -> (i32, i32, i32) {
    %c0_i32 = arith.constant 0 : i32
    return %arg0, %arg3, %arg2 : i32, i32, i32
  }
  func.func @transform_2(%arg0: i32, %arg1: i32, %arg2: i32, %arg3: i32) -> (i32, i32, i32) {
    %c0_i32 = arith.constant 0 : i32
    %c0_i32_0 = arith.constant 0 : i32
    return %arg0, %c0_i32, %arg2 : i32, i32, i32
  }
  func.func @transform_3(%arg0: i32, %arg1: i32, %arg2: i32, %arg3: i32) -> (i32, i32, i32) {
    %c0_i32 = arith.constant 0 : i32
    return %arg0, %arg1, %arg2 : i32, i32, i32
  }
}

module attributes {stable_mosaic.version = 11 : i64} {
  func.func @linear_kernel(%arg0: i32, %arg1: i32, %arg2: i32, %arg3: i32, %arg4: memref<1x16x32xf32, #tpu.memory_space<vmem>>, %arg5: memref<1x32x32xf32, #tpu.memory_space<vmem>>, %arg6: memref<1x1x32xf32, #tpu.memory_space<vmem>>, %arg7: memref<1x16x32xf32, #tpu.memory_space<vmem>>, %arg8: memref<16x32xf32, #tpu.memory_space<vmem>>) attributes {dimension_semantics = [#tpu.dimension_semantics<parallel>, #tpu.dimension_semantics<parallel>, #tpu.dimension_semantics<parallel>, #tpu.dimension_semantics<arbitrary>], iteration_bounds = array<i64: 1, 1, 1, 1>, scalar_prefetch = 0 : i64, scratch_operands = 1 : i64, tpu.core_type = #tpu.core_type<tc>, window_params = [{transform_indices = @transform_0, window_bounds = array<i64: 1, 16, 32>}, {transform_indices = @transform_1, window_bounds = array<i64: 1, 32, 32>}, {transform_indices = @transform_2, window_bounds = array<i64: 1, 1, 32>}, {transform_indices = @transform_3, window_bounds = array<i64: 1, 16, 32>}]} {
    %c0_i32 = arith.constant 0 : i32
    %0 = arith.cmpi eq, %arg3, %c0_i32 : i32
    %1 = arith.extui %0 : i1 to i32
    %c0_i32_0 = arith.constant 0 : i32
    %2 = arith.cmpi ne, %1, %c0_i32_0 : i32
    scf.if %2 {
      %cst_12 = arith.constant 0.000000e+00 : f32
      %14 = vector.broadcast %cst_12 : f32 to vector<16x32xf32>
      %c0_13 = arith.constant 0 : index
      %c0_14 = arith.constant 0 : index
      %15 = vector.load %arg8[%c0_13, %c0_14] : memref<16x32xf32, #tpu.memory_space<vmem>>, vector<16x32xf32>
      tpu.vector_store %arg8[%c0_13, %c0_14], %14 {strides = array<i32>} : memref<16x32xf32, #tpu.memory_space<vmem>>, vector<16x32xf32>,
    } else {
    }
    %c0 = arith.constant 0 : index
    %c0_1 = arith.constant 0 : index
    %3 = vector.load %arg8[%c0, %c0_1] : memref<16x32xf32, #tpu.memory_space<vmem>>, vector<16x32xf32>
    %c0_2 = arith.constant 0 : index
    %c0_3 = arith.constant 0 : index
    %c0_4 = arith.constant 0 : index
    %4 = vector.load %arg4[%c0_2, %c0_3, %c0_4] : memref<1x16x32xf32, #tpu.memory_space<vmem>>, vector<1x16x32xf32>
    %5 = vector.shape_cast %4 : vector<1x16x32xf32> to vector<16x32xf32>
    %c0_5 = arith.constant 0 : index
    %c0_6 = arith.constant 0 : index
    %c0_7 = arith.constant 0 : index
    %6 = vector.load %arg5[%c0_5, %c0_6, %c0_7] : memref<1x32x32xf32, #tpu.memory_space<vmem>>, vector<1x32x32xf32>
    %7 = vector.shape_cast %6 : vector<1x32x32xf32> to vector<32x32xf32>
    %cst = arith.constant dense<0.000000e+00> : vector<16x32xf32>
    %8 = tpu.matmul %5, %7, %cst {dimension_numbers = #tpu.dot_dimension_numbers<[1], [0], [0], [1], [0, 0, 1, 1], [], []>} : vector<16x32xf32>, vector<32x32xf32>, vector<16x32xf32> -> vector<16x32xf32>
    %9 = arith.addf %3, %8 : vector<16x32xf32>
    %c0_8 = arith.constant 0 : index
    %c0_9 = arith.constant 0 : index
    %10 = vector.load %arg8[%c0_8, %c0_9] : memref<16x32xf32, #tpu.memory_space<vmem>>, vector<16x32xf32>
    tpu.vector_store %arg8[%c0_8, %c0_9], %9 {strides = array<i32>} : memref<16x32xf32, #tpu.memory_space<vmem>>, vector<16x32xf32>,
    %c0_i32_10 = arith.constant 0 : i32
    %11 = arith.cmpi eq, %arg3, %c0_i32_10 : i32
    %12 = arith.extui %11 : i1 to i32
    %c0_i32_11 = arith.constant 0 : i32
    %13 = arith.cmpi ne, %12, %c0_i32_11 : i32
    scf.if %13 {
      %c0_12 = arith.constant 0 : index
      %c0_13 = arith.constant 0 : index
      %14 = vector.load %arg8[%c0_12, %c0_13] : memref<16x32xf32, #tpu.memory_space<vmem>>, vector<16x32xf32>
      %c0_14 = arith.constant 0 : index
      %c0_15 = arith.constant 0 : index
      %c0_16 = arith.constant 0 : index
      %15 = vector.load %arg6[%c0_14, %c0_15, %c0_16] : memref<1x1x32xf32, #tpu.memory_space<vmem>>, vector<1x1x32xf32>
      %16 = vector.shape_cast %15 : vector<1x1x32xf32> to vector<1x32xf32>
      %17 = vector.broadcast %16 : vector<1x32xf32> to vector<16x32xf32>
      %18 = arith.addf %14, %17 : vector<16x32xf32>
      %c0_17 = arith.constant 0 : index
      %c0_18 = arith.constant 0 : index
      %c0_19 = arith.constant 0 : index
      %19 = vector.load %arg7[%c0_17, %c0_18, %c0_19] : memref<1x16x32xf32, #tpu.memory_space<vmem>>, vector<1x16x32xf32>
      %20 = vector.shape_cast %19 : vector<1x16x32xf32> to vector<16x32xf32>
      %21 = vector.shape_cast %18 : vector<16x32xf32> to vector<1x16x32xf32>
      tpu.vector_store %arg7[%c0_17, %c0_18, %c0_19], %21 {strides = array<i32>} : memref<1x16x32xf32, #tpu.memory_space<vmem>>, vector<1x16x32xf32>,
    } else {
    }
    return
  }
  func.func @transform_0(%arg0: i32, %arg1: i32, %arg2: i32, %arg3: i32) -> (i32, i32, i32) {
    %c0_i32 = arith.constant 0 : i32
    return %arg0, %arg1, %arg3 : i32, i32, i32
  }
  func.func @transform_1(%arg0: i32, %arg1: i32, %arg2: i32, %arg3: i32) -> (i32, i32, i32) {
    %c0_i32 = arith.constant 0 : i32
    return %arg0, %arg3, %arg2 : i32, i32, i32
  }
  func.func @transform_2(%arg0: i32, %arg1: i32, %arg2: i32, %arg3: i32) -> (i32, i32, i32) {
    %c0_i32 = arith.constant 0 : i32
    %c0_i32_0 = arith.constant 0 : i32
    return %arg0, %c0_i32, %arg2 : i32, i32, i32
  }
  func.func @transform_3(%arg0: i32, %arg1: i32, %arg2: i32, %arg3: i32) -> (i32, i32, i32) {
    %c0_i32 = arith.constant 0 : i32
    return %arg0, %arg1, %arg2 : i32, i32, i32
  }
}

</mosaic_0001>

<bundles_post_ra>
// kernel: _lambda_.3
= control target key start
LH: loop header
LB: loop body
LE: loop exit
PB: predicated region body
PF: predicated region fallthrough
CT: control target
= control target key end

     0   :  { %s677_s12 = smov 0   ;;  %s679_s13 = smov 0   ;;  %s729_s0 = inlined_call_operand.vmem [shape: f32[3,16,32], index: 0, kind: input, shape index: {}]   ;;  %s730_s1 = inlined_call_operand.vmem [shape: f32[3,32,32], index: 1, kind: input, shape index: {}]   ;;  %s731_s2 = inlined_call_operand.vmem [shape: f32[3,1,32], index: 2, kind: input, shape index: {}]   ;;  %s732_s3 = inlined_call_operand.vmem [shape: f32[3,16,32], index: 3, kind: output, shape index: {}]  }
   0x1   :  { %s681_s14 = smov 0  }
   0x2 LB: > { %s39_s15 = sadd.s32 1, %s650_s13  ;;  %p575_p0 = scmp.ge.s32.totalorder %s654_s14, 1  ;;  %s654_s14 = sphi %s681_s14, %s13_s14   ;;  %s650_s13 = sphi %s679_s13, %s734_s13   ;;  %s646_s12 = sphi %s677_s12, %s733_s12  }
   0x3   : > { %p41_p1 = scmp.ge.s32.totalorder %s39_s15, 3  ;;  %p214_p2 = scmp.lt.s32.totalorder %s654_s14, 4 }
   0x5   : > { %s736_s15 = smov (%p41_p1, %s39_s15), 0  ;;  %p215_p3 = pnand %p575_p0, %p214_p2 }
   0x6   : > { %p271_p4 = scmp.lt.s32.totalorder (!%p215_p3), %s646_s12, 2 }
   0x7   : > { %218 = sbr.rel (%p215_p3) target bundleno = 232 (0xe8), region = 32 }
   0xc   : > { %vm319_vm0 = vcmask 261120   ;;  %v656_v0 = vmov 0.0   ;;  %s738_s12 = smov (!%p271_p4, %s646_s12), 2 }
   0xd   : > { %321 = vst.msk [vmem:[#allocation2 + $0x8] sm:$0xff] %vm319_vm0, %v656_v0  ;;  %320 = vst.msk [vmem:[#allocation2] sm:$0xff] %vm319_vm0, %v656_v0  ;;  %s588_s16 = sshll.u32 %s738_s12, 5  ;;  %s587_s20 = sshll.u32 %s738_s12, 4 }
   0xe   : > { %s294_s19 = scalar_lea.vmem %s730_s1, %s588_s16  ;;  %s281_s23 = scalar_lea.vmem %s729_s0, %s587_s20 }
   0xf   : > { %v329_v1 = vld [vmem:[%s294_s19 + $0x18] sm:$0xff]  ;;  %v328_v2 = vld [vmem:[%s294_s19 + $0x10] sm:$0xff]  ;;  %v324_v3 = vld [vmem:[%s281_s23] sm:$0xff]  ;;  %s301_s26 = scalar_lea.vmem %s731_s2, %s738_s12  ;;  %s313_s29 = scalar_lea.vmem %s732_s3, %s587_s20 }
  0x10   : > { %596 = vmatprep.subr.mxu0 %v329_v1  ;;  %v327_v4 = vld [vmem:[%s294_s19 + $0x8] sm:$0xff]  ;;  %604 = vmatprep.mubr.msk.f32.mxu0 %vm319_vm0, %v324_v3  ;;  %v326_v5 = vld [vmem:[%s294_s19] sm:$0xff] }
  0x11   : > { %597 = vmatpush3.msra.mxu0 %v329_v1  ;;  %v325_v6 = vld [vmem:[%s281_s23 + $0x8] sm:$0xff]  ;;  %v584_v13 = vld [vmem:[%s301_s26] ss:$0 sm:$0xff] }
  0x12   : > { %598 = vmatprep.subr.mxu0 %v328_v2 }
  0x13   : > { %599 = vmatpush3.msra.mxu0 %v328_v2 }
  0x14   : > { %600 = vmatprep.subr.mxu0 %v327_v4  ;;  %v323_v7 = vld [vmem:[#allocation2 + $0x8] sm:$0xff]  ;;  %v322_v9 = vld [vmem:[#allocation2] sm:$0xff] }
  0x15   : > { %601 = vmatpush3.msra.mxu0 %v327_v4 }
  0x16   : > { %602 = vmatprep.subr.mxu0 %v326_v5 }
  0x17   : > { %603 = vmatpush3.msra.mxu0 %v326_v5 }
  0x18   : > { %605 = vmatmul.mubr.msk.f32.vlgmr.msra.gmra.mxu0 %vm319_vm0, %v325_v6 }
  0xd8   : > { %v606_v8 = vpop.f32.mrf.mxu0 }
  0xd9   : > { %v413_v10 = vadd.f32 %v606_v8, %v323_v7 }
  0xda   : > { %v403_v11 = vpop.f32.mrf.mxu0 }
  0xdb   : > { %415 = vst.msk [vmem:[#allocation2 + $0x8] sm:$0xff] %vm319_vm0, %v413_v10  ;;  %v412_v12 = vadd.f32 %v403_v11, %v322_v9 }
  0xdd   : > { %414 = vst.msk [vmem:[#allocation2] sm:$0xff] %vm319_vm0, %v412_v12 }
  0xe2   : > { %v420_v14 = vld [vmem:[#allocation2 + $0x8] sm:$0xff] }
  0xe3   : > { %v429_v15 = vadd.f32 %v584_v13, %v420_v14 }
  0xe4   : > { %v419_v16 = vld [vmem:[#allocation2] sm:$0xff] }
  0xe5   : > { %431 = vst.msk [vmem:[%s313_s29 + $0x8] sm:$0xff] %vm319_vm0, %v429_v15  ;;  %v428_v17 = vadd.f32 %v584_v13, %v419_v16 }
  0xe7   : > { %430 = vst.msk [vmem:[%s313_s29] sm:$0xff] %vm319_vm0, %v428_v17 }
  0xe8 PF: > { %s13_s14 = sadd.s32 1, %s654_s14   ;;  %s733_s12 = smov %s650_s13 }
  0xe9   : > { %p10_p5 = scmp.ge.s32.totalorder %s13_s14, 5   ;;  %s734_s13 = smov %s736_s15 }
  0xeb   :  { %12 = sbr.rel (!%p10_p5) target bundleno = 2 (0x2), region = 76 }

// kernel: _lambda_.5
= control target key start
LH: loop header
LB: loop body
LE: loop exit
PB: predicated region body
PF: predicated region fallthrough
CT: control target
= control target key end

     0   :  { %vm19_vm0 = vcmask 261120   ;;  %v194_v3 = vmov 0.0   ;;  %s250_s0 = inlined_call_operand.vmem [shape: f32[1,16,32], index: 0, kind: input, shape index: {}]   ;;  %s251_s1 = inlined_call_operand.vmem [shape: f32[1,32,32], index: 1, kind: input, shape index: {}]   ;;  %s252_s2 = inlined_call_operand.vmem [shape: f32[1,1,32], index: 2, kind: input, shape index: {}]   ;;  %s253_s3 = inlined_call_operand.hbm [shape: f32[1,16,32], index: 3, kind: output, shape index: {}]  }
   0x1   :  { %v29_v0 = vld [vmem:[%s251_s1 + $0x18] sm:$0xff]  ;;  %v28_v1 = vld [vmem:[%s251_s1 + $0x10] sm:$0xff]  ;;  %v24_v2 = vld [vmem:[%s250_s0] sm:$0xff]  ;;  %21 = vst.msk [vmem:[#allocation2 + $0x8] sm:$0xff] %vm19_vm0, %v194_v3 }
   0x2   :  { %157 = vmatprep.subr.mxu0 %v29_v0  ;;  %20 = vst.msk [vmem:[#allocation2] sm:$0xff] %vm19_vm0, %v194_v3  ;;  %v27_v4 = vld [vmem:[%s251_s1 + $0x8] sm:$0xff]  ;;  %165 = vmatprep.mubr.msk.f32.mxu0 %vm19_vm0, %v24_v2 }
   0x3   :  { %158 = vmatpush3.msra.mxu0 %v29_v0 }
   0x4   :  { %8 = vsyncpa [#allocation4], 0  ;;  %159 = vmatprep.subr.mxu0 %v28_v1  ;;  %v26_v5 = vld [vmem:[%s251_s1] sm:$0xff]  ;;  %v25_v6 = vld [vmem:[%s250_s0 + $0x8] sm:$0xff]  ;;  %s195_s25 = smov [#allocation3]  }
   0x5   :  { %160 = vmatpush3.msra.mxu0 %v28_v1  ;;  %v150_v13 = vld [vmem:[%s252_s2] ss:$0 sm:$0xff]  ;;  %s137_s0 = sshll.u32 %s195_s25, 4  ;;  %s138_s0 = int_to_ptr.vmem [resolvable:$true] %s137_s0 }
   0x6   :  { %161 = vmatprep.subr.mxu0 %v27_v4  ;;  %s172_s26 = scalar_lea.vmem %s138_s0, 256  ;;  %p177_p1 = scmp.lt.s32.totalorder %s138_s0, %s138_s0 }
   0x7   :  { %162 = vmatpush3.msra.mxu0 %v27_v4  ;;  %p173_p0 = scmp.ne.s32.totalorder %s138_s0, %s172_s26  ;;  %p178_p2 = scmp.lt.s32.totalorder %s172_s26, %s172_s26 }
   0x8   :  { %163 = vmatprep.subr.mxu0 %v26_v5  ;;  %v23_v7 = vld [vmem:[#allocation2 + $0x8] sm:$0xff] }
   0x9   :  { %164 = vmatpush3.msra.mxu0 %v26_v5  ;;  %v22_v9 = vld [vmem:[#allocation2] sm:$0xff]  ;;  %p179_p3 = por %p178_p2, %p177_p1 }
   0xa   :  { %166 = vmatmul.mubr.msk.f32.vlgmr.msra.gmra.mxu0 %vm19_vm0, %v25_v6 }
   0xb   :  { %p180_p4 = pnand %p179_p3, %p173_p0 }
  0xca   :  { %v167_v8 = vpop.f32.mrf.mxu0 }
  0xcb   :  { %v113_v10 = vadd.f32 %v167_v8, %v23_v7 }
  0xcc   :  { %v103_v11 = vpop.f32.mrf.mxu0 }
  0xcd   :  { %115 = vst.msk [vmem:[#allocation2 + $0x8] sm:$0xff] %vm19_vm0, %v113_v10  ;;  %v112_v12 = vadd.f32 %v103_v11, %v22_v9 }
  0xcf   :  { %114 = vst.msk [vmem:[#allocation2] sm:$0xff] %vm19_vm0, %v112_v12 }
  0xd4   :  { %v120_v14 = vld [vmem:[#allocation2 + $0x8] sm:$0xff] }
  0xd5   :  { %v129_v15 = vadd.f32 %v150_v13, %v120_v14 }
  0xd6   :  { %v119_v16 = vld [vmem:[#allocation2] sm:$0xff] }
  0xd7   :  { %v128_v17 = vadd.f32 %v150_v13, %v119_v16  ;;  %131 = vst.msk [vmem:[#allocation3 + $0x8] sm:$0xff] %vm19_vm0, %v129_v15 }
  0xd9   :  { %130 = vst.msk [vmem:[#allocation3] sm:$0xff] %vm19_vm0, %v128_v17 }
  0xda   :  { %183 = shalt.err (!%p180_p4)
}
  0xdb   :  { %s196_s27 = smov 128   ;;  %s197_s2 = smov 8  }
  0xdc   :  { %143 = dma.vmem_to_hbm [thread:$0]  %s138_s0, 256, %s253_s3, [#allocation4], %s196_s27, %s196_s27, %s197_s2  }
  0xdd   :  { %192 = dma.done.wait [#allocation4], 256  }
  0xde   :  { %193 = vsyncadd [#allocation4], 4294967040 }
  0xdf   :  { %147 = vsyncpa [#allocation4], 1 }

// kernel: _lambda_.4
= control target key start
LH: loop header
LB: loop body
LE: loop exit
PB: predicated region body
PF: predicated region fallthrough
CT: control target
= control target key end

     0   :  { %s1470_s12 = smov 0   ;;  %s1472_s13 = smov 0   ;;  %s1646_s0 = inlined_call_operand.vmem [shape: f32[2,8,32], index: 0, kind: input, shape index: {}]   ;;  %s1647_s1 = inlined_call_operand.vmem [shape: f32[2,8,32], index: 1, kind: input, shape index: {}]   ;;  %s1648_s2 = inlined_call_operand.vmem [shape: f32[2,8,32], index: 2, kind: input, shape index: {}]   ;;  %s1649_s3 = inlined_call_operand.vmem [shape: f32[2,8,32], index: 3, kind: output, shape index: {}]  }
   0x1   :  { %s1474_s14 = smov 0  }
   0x2 LB: > { %s39_s15 = sadd.s32 1, %s1431_s13  ;;  %p1264_p0 = scmp.ge.s32.totalorder %s1435_s14, 1  ;;  %s1435_s14 = sphi %s1474_s14, %s13_s14   ;;  %s1431_s13 = sphi %s1472_s13, %s1651_s13   ;;  %s1427_s12 = sphi %s1470_s12, %s1650_s12  }
   0x3   : > { %p41_p1 = scmp.ge.s32.totalorder %s39_s15, 2  ;;  %p214_p2 = scmp.lt.s32.totalorder %s1435_s14, 3 }
   0x5   : > { %s1653_s15 = smov (%p41_p1, %s39_s15), 0  ;;  %p215_p3 = pnand %p1264_p0, %p214_p2 }
   0x6   : > { %p268_p4 = scmp.lt.s32.totalorder (!%p215_p3), %s1427_s12, 1  ;;  %s1441_s23 = smov (!%p215_p3), 120  }
   0x7   : > { %218 = sbr.rel (%p215_p3) target bundleno = 1363 (0x553), region = 32  ;;  %s1442_s24 = smov (!%p215_p3), 112  }
   0x8   : > { %s1443_s25 = smov (!%p215_p3), 104   ;;  %s1447_s29 = smov (!%p215_p3), 8  }
   0x9   : > { %s1448_s30 = smov (!%p215_p3), 16   ;;  %s1449_s4 = smov (!%p215_p3), 24  }
   0xc   : > { %v1437_v0 = vmov 0.0   ;;  %vm1438_vm0 = vmmov 0   ;;  %s1655_s12 = smov (!%p268_p4, %s1427_s12), 1  ;;  %vm321_vm1 = vcmask 64512   ;;  %vm312_vm2 = vcmask 31744  }
   0xd   : > { %1299 = vmatprep.subr.mxu0 %v1437_v0  ;;  %1301 = vmatprep.mubr.msk.f32.mxu0 %vm1438_vm0, %v1437_v0  ;;  %s1494_s16 = sshll.u32 %s1655_s12, 3  ;;  %v1439_v4 = vmov -inf   ;;  %314 = vst.msk [vmem:[#allocation3] sm:$0xff] %vm312_vm2, %v1437_v0  ;;  %v1440_v8 = vmov 0   ;;  %vm420_vm3 = vcmask 7168   ;;  %v1444_v35 = vmov 1  }
   0xe   : > { %1304 = vmatprep.subr.mxu1 %v1437_v0  ;;  %1306 = vmatprep.mubr.msk.f32.mxu1 %vm1438_vm0, %v1437_v0  ;;  %s287_s19 = scalar_lea.vmem %s1647_s1, %s1494_s16  ;;  %s277_s22 = scalar_lea.vmem %s1646_s0, %s1494_s16  ;;  %313 = vst.msk [vmem:[#allocation2] sm:$0xff] %vm312_vm2, %v1439_v4  ;;  %v1445_v36 = vmov 2   ;;  %vm605_vm4 = vcmask 15368   ;;  %vm315_vm5 = vcmask 261120   ;;  %v1446_v43 = vmov 3  }
   0xf   : > { %v318_v1 = vld [vmem:[%s287_s19] sm:$0xff]  ;;  %1376 = vset.pattern.permute.xlu0 %v1440_v8  ;;  %s297_s28 = scalar_lea.vmem %s1648_s2, %s1494_s16  ;;  %1377 = vset.pattern.permute.xlu1 %v1444_v35  ;;  %316 = vst.msk [vmem:[#allocation4] sm:$0xff] %vm315_vm5, %v1437_v0  ;;  %vm799_vm6 = vcmask 23568   ;;  %vm992_vm7 = vcmask 31768   ;;  %vm696_vm8 = vcmask 130112   ;;  %vm889_vm9 = vcmask 195712   ;;  %s307_s7 = scalar_lea.vmem %s1649_s3, %s1494_s16 }
  0x10   : > { %1300 = vmatpush3.xpose.msk.msra.mxu0 %vm321_vm1, %v318_v1  ;;  %v317_v2 = vld [vmem:[%s277_s22] sm:$0xff]  ;;  %507 = vrot.lane.b32.xlu1 %v318_v1, %s1441_s23  ;;  %vm1082_vm10 = vcmask 261312  }
  0x11   : > { %v320_v3 = vmul.f32 2.828427, %v317_v2  ;;  %1314 = vmatprep.subr.mxu0 %v1437_v0  ;;  %v1523_v13 = vld [vmem:[%s297_s28] sm:$0xff] }
  0x12   : > { %1305 = vmatpush3.msra.mxu1 %v1523_v13 }
  0x13   : > { %1302 = vmatmul.mubr.msk.f32.vlgmr.msra.gmra.mxu0 %vm321_vm1, %v320_v3  ;;  %1309 = vmatprep.subr.mxu1 %v1437_v0 }
  0x14   : > { %1316 = vmatprep.mubr.msk.f32.mxu0 %vm1438_vm0, %v1437_v0  ;;  %505 = vrot.lane.b32.xlu1 %v320_v3, %s1441_s23 }
  0x15   : > { %v398_v9 = vld [vmem:[#allocation2] sm:$0xff] }
  0x16   : > { %v422_v60 = vld [vmem:[#allocation4] sm:$0xff] }
  0x18   : > { %701 = vrot.lane.b32.xlu1 %v318_v1, %s1442_s24 }
  0x1c   : > { %699 = vrot.lane.b32.xlu1 %v320_v3, %s1442_s24 }
  0x20   : > { %894 = vrot.lane.b32.xlu1 %v318_v1, %s1443_s25 }
  0x24   : > { %892 = vrot.lane.b32.xlu1 %v320_v3, %s1443_s25 }
  0x82   : > { %v508_v16 = vpop.permute.xlu1 %507 }
  0x86   : > { %v506_v18 = vpop.permute.xlu1 %505 }
  0x8a   : > { %v702_v19 = vpop.permute.xlu1 %701 }
  0x8e   : > { %v700_v21 = vpop.permute.xlu1 %699 }
  0x92   : > { %v895_v22 = vpop.permute.xlu1 %894 }
  0x96   : > { %v893_v23 = vpop.permute.xlu1 %892 }
  0xd3   : > { %v394_v5 = vpop.f32.mrf.mxu0 }
  0xd4   : > { %v399_v6 = vsel %vm321_vm1, %v394_v5, -inf }
  0xd5   : > { %400 = vmax.xlane.f32.xlu0 %v399_v6  ;;  %v1303_v7 = vpop.f32.mrf.mxu0 }
 0x15e   : > { %v401_v10 = vpop.xlane.xlu0 %400 }
 0x15f   : > { %v402_v11 = vmax.f32 %v398_v9, %v401_v10 }
 0x161   : > { %v403_v12 = vsub.f32 %v398_v9, %v402_v11  ;;  %504 = vst.msk [vmem:[#allocation2] sm:$0xff] %vm420_vm3, %v402_v11  ;;  %408 = vperm.xlu0 %1376, %v402_v11  }
 0x163   : > { %v404_v37 = vmul.f32 1.442695, %v403_v12 }
 0x165   : > { %1378 = vset.pattern.permute.xlu0 %v1445_v36 }
 0x168   : > { %v1555_v39 = vld [vmem:[#allocation2] sm:$0xff] }
 0x1dc   : > { %v409_v14 = vpop.permute.xlu0 %408 }
 0x1dd   : > { %v411_v15 = vsub.f32 %v394_v5, %v409_v14 }
 0x1df   : > { %v412_v17 = vmul.f32 1.442695, %v411_v15 }
 0x1e1   : > { %1389 = vpow2.f32 %v412_v17 }
 0x1e2   : > { %1391 = vpow2.f32 %v404_v37 }
 0x1ee   : > { %v1527_v20 = vpop.eup %1389 }
 0x1ef   : > { %1307 = vmatmul.mubr.msk.f32.vlgmr.msra.gmra.mxu1 %vm321_vm1, %v1527_v20  ;;  %v1571_v47 = vpop.eup %1391  ;;  %v416_v52 = vsel %vm321_vm1, %v1527_v20, 0.0 }
 0x1f0   : > { %1310 = vmatpush3.xpose.msk.msra.mxu1 %vm321_vm1, %v508_v16  ;;  %1311 = vmatprep.mubr.msk.f32.mxu1 %vm1438_vm0, %v1437_v0 }
 0x1f1   : > { %1319 = vmatprep.subr.mxu1 %v1437_v0 }
 0x1f3   : > { %1312 = vmatmul.mubr.msk.f32.vlgmr.msra.gmra.mxu1 %vm321_vm1, %v506_v18 }
 0x1f4   : > { %1320 = vmatpush3.xpose.msk.msra.mxu1 %vm321_vm1, %v702_v19  ;;  %1321 = vmatprep.mubr.msk.f32.mxu1 %vm1438_vm0, %v1437_v0 }
 0x1f5   : > { %1329 = vmatprep.subr.mxu1 %v1437_v0 }
 0x1f7   : > { %1322 = vmatmul.mubr.msk.f32.vlgmr.msra.gmra.mxu1 %vm321_vm1, %v700_v21 }
 0x1f8   : > { %1330 = vmatpush3.xpose.msk.msra.mxu1 %vm321_vm1, %v895_v22  ;;  %1331 = vmatprep.mubr.msk.f32.mxu1 %vm1438_vm0, %v1437_v0 }
 0x1fb   : > { %1332 = vmatmul.mubr.msk.f32.vlgmr.msra.gmra.mxu1 %vm321_vm1, %v893_v23 }
 0x2af   : > { %v1545_v24 = vpop.f32.mrf.mxu1 }
 0x2b1   : > { %v1308_v25 = vpop.f32.mrf.mxu1 }
 0x2b3   : > { %v579_v26 = vpop.f32.mrf.mxu1 }
 0x2b4   : > { %v584_v27 = vsel %vm321_vm1, %v579_v26, -inf }
 0x2b5   : > { %585 = vmax.xlane.f32.xlu1 %v584_v27  ;;  %v1313_v28 = vpop.f32.mrf.mxu1 }
 0x2b7   : > { %v773_v29 = vpop.f32.mrf.mxu1 }
 0x2b8   : > { %v778_v30 = vsel %vm321_vm1, %v773_v29, -inf }
 0x2b9   : > { %779 = vmax.xlane.f32.xlu0 %v778_v30  ;;  %v1323_v31 = vpop.f32.mrf.mxu1 }
 0x2bb   : > { %v1549_v32 = vpop.f32.mrf.mxu1 }
 0x2bc   : > { %v971_v33 = vsel %vm321_vm1, %v1549_v32, -inf }
 0x2bd   : > { %972 = vmax.xlane.f32.xlu1 %v971_v33  ;;  %v1333_v34 = vpop.f32.mrf.mxu1 }
 0x33e   : > { %v586_v38 = vpop.xlane.xlu1 %585 }
 0x33f   : > { %v1558_v40 = vmax.f32 %v1555_v39, %v586_v38 }
 0x341   : > { %v588_v41 = vsub.f32 %v1555_v39, %v1558_v40  ;;  %698 = vst.msk [vmem:[#allocation2] sm:$0xff] %vm605_vm4, %v1558_v40  ;;  %593 = vperm.xlu1 %1377, %v1558_v40  }
 0x342   : > { %v780_v42 = vpop.xlane.xlu0 %779 }
 0x345   : > { %615 = vrot.lane.b32.xlu1 %v1523_v13, %s1441_s23 }
 0x346   : > { %1379 = vset.pattern.permute.xlu1 %v1446_v43  ;;  %v973_v48 = vpop.xlane.xlu1 %972 }
 0x348   : > { %v777_v44 = vld [vmem:[#allocation2] sm:$0xff] }
 0x349   : > { %v781_v45 = vmax.f32 %v777_v44, %v780_v42 }
 0x34b   : > { %v782_v46 = vsub.f32 %v777_v44, %v781_v45  ;;  %891 = vst.msk [vmem:[#allocation2] sm:$0xff] %vm799_vm6, %v781_v45  ;;  %787 = vperm.xlu0 %1378, %v781_v45  }
 0x34d   : > { %v783_v6 = vmul.f32 1.442695, %v782_v46 }
 0x34f   : > { %1380 = vset.pattern.permute.xlu0 %v1440_v8 }
 0x350   : > { %425 = vperm.xlu0 %1380, %v1571_v47  }
 0x352   : > { %v1575_v49 = vld [vmem:[#allocation2] sm:$0xff] }
 0x353   : > { %v1578_v50 = vmax.f32 %v1575_v49, %v973_v48 }
 0x354   : > { %1382 = vset.pattern.permute.xlu0 %v1445_v36 }
 0x355   : > { %v975_v51 = vsub.f32 %v1575_v49, %v1578_v50  ;;  %1084 = vst.msk [vmem:[#allocation2] sm:$0xff] %vm992_vm7, %v1578_v50  ;;  %980 = vperm.xlu1 %1379, %v1578_v50  }
 0x359   : > { %808 = vrot.lane.b32.xlu1 %v1523_v13, %s1442_s24 }
 0x35a   : > { %1381 = vset.pattern.permute.xlu1 %v1444_v35 }
 0x35d   : > { %1001 = vrot.lane.b32.xlu1 %v1523_v13, %s1443_s25  ;;  %v589_v13 = vmul.f32 1.442695, %v588_v41 }
 0x381   : > { %417 = vadd.xlane.f32.xlu1 %v416_v52 }
 0x3bc   : > { %v594_v53 = vpop.permute.xlu1 %593 }
 0x3bd   : > { %v596_v54 = vsub.f32 %v579_v26, %v594_v53 }
 0x3bf   : > { %v597_v55 = vmul.f32 1.442695, %v596_v54 }
 0x3c0   : > { %v616_v56 = vpop.permute.xlu1 %615 }
 0x3c1   : > { %1393 = vpow2.f32 %v597_v55  ;;  %1315 = vmatpush3.msra.mxu0 %v616_v56 }
 0x3c2   : > { %1324 = vmatprep.subr.mxu0 %v1437_v0 }
 0x3c6   : > { %v788_v57 = vpop.permute.xlu0 %787 }
 0x3c7   : > { %v790_v58 = vsub.f32 %v773_v29, %v788_v57 }
 0x3c9   : > { %v791_v59 = vmul.f32 1.442695, %v790_v58 }
 0x3cb   : > { %1395 = vpow2.f32 %v791_v59  ;;  %v426_v61 = vpop.permute.xlu0 %425 }
 0x3cc   : > { %v428_v62 = vmul.f32 %v426_v61, %v422_v60 }
 0x3ce   : > { %v1394_v63 = vpop.eup %1393  ;;  %v502_v1 = vadd.f32 %v1545_v24, %v428_v62  ;;  %v976_v24 = vmul.f32 1.442695, %v975_v51 }
 0x3cf   : > { %1317 = vmatmul.mubr.msk.f32.vlgmr.msra.gmra.mxu0 %vm321_vm1, %v1394_v63  ;;  %v601_v2 = vsel %vm321_vm1, %v1394_v63, 0.0 }
 0x3d0   : > { %503 = vst.msk [vmem:[#allocation4] sm:$0xff] %vm321_vm1, %v502_v1  ;;  %v981_v3 = vpop.permute.xlu1 %980  ;;  %602 = vadd.xlane.f32.xlu0 %v601_v2  ;;  %1326 = vmatprep.mubr.msk.f32.mxu0 %vm1438_vm0, %v1437_v0 }
 0x3d1   : > { %v983_v4 = vsub.f32 %v1549_v32, %v981_v3 }
 0x3d3   : > { %v984_v5 = vmul.f32 1.442695, %v983_v4 }
 0x3d4   : > { %v809_v7 = vpop.permute.xlu1 %808 }
 0x3d5   : > { %1397 = vpow2.f32 %v984_v5  ;;  %1325 = vmatpush3.msra.mxu0 %v809_v7 }
 0x3d6   : > { %1334 = vmatprep.subr.mxu0 %v1437_v0  ;;  %1399 = vpow2.f32 %v783_v6 }
 0x3d7   : > { %1401 = vpow2.f32 %v589_v13  ;;  %v607_v44 = vld [vmem:[#allocation4] sm:$0xff] }
 0x3d8   : > { %v1396_v9 = vpop.eup %1395  ;;  %v1002_v10 = vpop.permute.xlu1 %1001  ;;  %1403 = vpow2.f32 %v976_v24 }
 0x3d9   : > { %1327 = vmatmul.mubr.msk.f32.vlgmr.msra.gmra.mxu0 %vm321_vm1, %v1396_v9  ;;  %v795_v11 = vsel %vm321_vm1, %v1396_v9, 0.0 }
 0x3da   : > { %796 = vadd.xlane.f32.xlu1 %v795_v11  ;;  %1335 = vmatpush3.msra.mxu0 %v1002_v10 }
 0x3db   : > { %1336 = vmatprep.mubr.msk.f32.mxu0 %vm1438_vm0, %v1437_v0  ;;  %v414_v0 = vld [vmem:[#allocation3] sm:$0xff] }
 0x3dc   : > { %v415_v17 = vmul.f32 %v1571_v47, %v414_v0 }
 0x3e2   : > { %v1398_v12 = vpop.eup %1397 }
 0x3e3   : > { %1337 = vmatmul.mubr.msk.f32.vlgmr.msra.gmra.mxu0 %vm321_vm1, %v1398_v12  ;;  %v988_v14 = vsel %vm321_vm1, %v1398_v12, 0.0  ;;  %v1400_v15 = vpop.eup %1399 }
 0x3e4   : > { %989 = vadd.xlane.f32.xlu1 %v988_v14  ;;  %v1402_v16 = vpop.eup %1401 }
 0x3e5   : > { %v1404_v29 = vpop.eup %1403 }
 0x3e6   : > { %804 = vperm.xlu0 %1382, %v1400_v15  }
 0x3ea   : > { %1388 = vset.pattern.permute.xlu0 %v1446_v43 }
 0x3f5   : > { %610 = vperm.xlu1 %1381, %v1402_v16  }
 0x3f9   : > { %1383 = vset.pattern.permute.xlu1 %v1446_v43 }
 0x40a   : > { %v418_v18 = vpop.xlane.xlu1 %417 }
 0x40b   : > { %v419_v19 = vadd.f32 %v418_v18, %v415_v17 }
 0x40d   : > { %421 = vst.msk [vmem:[#allocation3] sm:$0xff] %vm420_vm3, %v419_v19 }
 0x414   : > { %v599_v20 = vld [vmem:[#allocation3] sm:$0xff] }
 0x415   : > { %v600_v21 = vmul.f32 %v1402_v16, %v599_v20 }
 0x459   : > { %v603_v22 = vpop.xlane.xlu0 %602 }
 0x45a   : > { %v604_v23 = vadd.f32 %v603_v22, %v600_v21 }
 0x45c   : > { %606 = vst.msk [vmem:[#allocation3] sm:$0xff] %vm605_vm4, %v604_v23 }
 0x461   : > { %v805_v49 = vpop.permute.xlu0 %804 }
 0x463   : > { %v793_v25 = vld [vmem:[#allocation3] sm:$0xff]  ;;  %v797_v27 = vpop.xlane.xlu1 %796 }
 0x464   : > { %v794_v26 = vmul.f32 %v1400_v15, %v793_v25 }
 0x466   : > { %v798_v28 = vadd.f32 %v797_v27, %v794_v26 }
 0x468   : > { %800 = vst.msk [vmem:[#allocation3] sm:$0xff] %vm799_vm6, %v798_v28 }
 0x46d   : > { %v990_v32 = vpop.xlane.xlu1 %989 }
 0x46f   : > { %v986_v30 = vld [vmem:[#allocation3] sm:$0xff] }
 0x470   : > { %v987_v31 = vmul.f32 %v1404_v29, %v986_v30 }
 0x472   : > { %v991_v33 = vadd.f32 %v990_v32, %v987_v31 }
 0x474   : > { %993 = vst.msk [vmem:[#allocation3] sm:$0xff] %vm992_vm7, %v991_v33 }
 0x47b   : > { %v1089_v40 = vld [vmem:[#allocation3] sm:$0xff] }
 0x48f   : > { %v687_v34 = vpop.f32.mrf.mxu0 }
 0x490   : > { %692 = vrot.lane.b32.xlu1 %v687_v34, %s1447_s29 }
 0x491   : > { %v1318_v37 = vpop.f32.mrf.mxu0 }
 0x494   : > { %997 = vperm.xlu1 %1383, %v1404_v29  }
 0x498   : > { %1384 = vset.pattern.permute.xlu1 %v1440_v8  ;;  %v611_v8 = vpop.permute.xlu1 %610 }
 0x499   : > { %v880_v38 = vpop.f32.mrf.mxu0  ;;  %v613_v45 = vmul.f32 %v611_v8, %v607_v44 }
 0x49a   : > { %885 = vrot.lane.b32.xlu1 %v880_v38, %s1448_s30 }
 0x49b   : > { %v1328_v39 = vpop.f32.mrf.mxu0 }
 0x49e   : > { %1092 = vperm.xlu1 %1384, %v1089_v40  }
 0x4a2   : > { %1385 = vset.pattern.permute.xlu1 %v1444_v35 }
 0x4a3   : > { %v1073_v41 = vpop.f32.mrf.mxu0 }
 0x4a4   : > { %1078 = vrot.lane.b32.xlu1 %v1073_v41, %s1449_s4 }
 0x4a5   : > { %v1338_v42 = vpop.f32.mrf.mxu0 }
 0x4a8   : > { %1102 = vperm.xlu1 %1385, %v1089_v40  }
 0x4ac   : > { %1386 = vset.pattern.permute.xlu1 %v1445_v36 }
 0x4ad   : > { %1112 = vperm.xlu1 %1386, %v1089_v40  }
 0x4b1   : > { %1387 = vset.pattern.permute.xlu1 %v1446_v43 }
 0x4b2   : > { %1122 = vperm.xlu1 %1387, %v1089_v40  }
 0x502   : > { %v693_v46 = vpop.permute.xlu1 %692 }
 0x503   : > { %v695_v47 = vadd.f32 %v693_v46, %v613_v45 }
 0x505   : > { %697 = vst.msk [vmem:[#allocation4] sm:$0xff] %vm696_vm8, %v695_v47 }
 0x50c   : > { %v801_v48 = vld [vmem:[#allocation4] sm:$0xff] }
 0x50d   : > { %v807_v50 = vmul.f32 %v805_v49, %v801_v48 }
 0x50f   : > { %v998_v35 = vpop.permute.xlu1 %997 }
 0x513   : > { %v886_v51 = vpop.permute.xlu1 %885 }
 0x514   : > { %v888_v52 = vadd.f32 %v886_v51, %v807_v50 }
 0x516   : > { %890 = vst.msk [vmem:[#allocation4] sm:$0xff] %vm889_vm9, %v888_v52 }
 0x519   : > { %v1093_v36 = vpop.permute.xlu1 %1092 }
 0x51a   : > { %1405 = vrcp.f32 %v1093_v36 }
 0x51d   : > { %v994_v43 = vld [vmem:[#allocation4] sm:$0xff]  ;;  %v1079_v54 = vpop.permute.xlu1 %1078 }
 0x51e   : > { %v1000_v53 = vmul.f32 %v998_v35, %v994_v43 }
 0x520   : > { %v1081_v55 = vadd.f32 %v1079_v54, %v1000_v53 }
 0x522   : > { %1083 = vst.msk [vmem:[#allocation4] sm:$0xff] %vm1082_vm10, %v1081_v55 }
 0x523   : > { %v1103_v56 = vpop.permute.xlu1 %1102 }
 0x524   : > { %1407 = vrcp.f32 %v1103_v56 }
 0x527   : > { %v1406_v57 = vpop.eup %1405 }
 0x528   : > { %v1113_v60 = vpop.permute.xlu1 %1112 }
 0x529   : > { %v1088_v58 = vld [vmem:[#allocation4] sm:$0xff]  ;;  %1409 = vrcp.f32 %v1113_v60 }
 0x52a   : > { %v1096_v59 = vmul.f32 %v1406_v57, %v1088_v58 }
 0x52c   : > { %1097 = vst.msk [vmem:[#allocation4] sm:$0xff] %vm321_vm1, %v1096_v59 }
 0x52d   : > { %v1123_v1 = vpop.permute.xlu1 %1122 }
 0x52e   : > { %1411 = vrcp.f32 %v1123_v1 }
 0x531   : > { %v1408_v61 = vpop.eup %1407 }
 0x533   : > { %v1098_v62 = vld [vmem:[#allocation4] sm:$0xff] }
 0x534   : > { %v1106_v63 = vmul.f32 %v1408_v61, %v1098_v62 }
 0x536   : > { %1107 = vst.msk [vmem:[#allocation4] sm:$0xff] %vm696_vm8, %v1106_v63  ;;  %v1410_v2 = vpop.eup %1409 }
 0x53b   : > { %v1412_v5 = vpop.eup %1411 }
 0x53d   : > { %v1108_v3 = vld [vmem:[#allocation4] sm:$0xff] }
 0x53e   : > { %v1116_v4 = vmul.f32 %v1410_v2, %v1108_v3 }
 0x540   : > { %1117 = vst.msk [vmem:[#allocation4] sm:$0xff] %vm889_vm9, %v1116_v4 }
 0x547   : > { %v1118_v6 = vld [vmem:[#allocation4] sm:$0xff] }
 0x548   : > { %v1126_v7 = vmul.f32 %v1412_v5, %v1118_v6 }
 0x54a   : > { %1127 = vst.msk [vmem:[#allocation4] sm:$0xff] %vm1082_vm10, %v1126_v7 }
 0x551   : > { %v1128_v9 = vld [vmem:[#allocation4] sm:$0xff] }
 0x552   : > { %1130 = vst.msk [vmem:[%s307_s7] sm:$0xff] %vm315_vm5, %v1128_v9 }
 0x553 PF: > { %s13_s14 = sadd.s32 1, %s1435_s14   ;;  %s1650_s12 = smov %s1431_s13 }
 0x554   : > { %p10_p5 = scmp.ge.s32.totalorder %s13_s14, 4   ;;  %s1651_s13 = smov %s1653_s15 }
 0x556   :  { %12 = sbr.rel (!%p10_p5) target bundleno = 2 (0x2), region = 76 }

</bundles_post_ra>
